<compile_context>
chip_gen: v5e
topology: v5e:2x2
jax: 0.10.0
libtpu: 0.0.40
codegen_flags: <defaults>
</compile_context>

<pallas_src>
import jax
import jax.numpy as jnp
from jax import lax
from jax.experimental import pallas as pl
from jax.experimental.pallas import tpu as pltpu


def projector_kernel(xf_ref, stats_ref, a_ref, w0a_ref, w0b_ref,
                     b0_ref, w1_ref, b1_ref, w2p_ref, o_ref):
    """Fused: circular Conv1d (as one MXU matmul) -> [conv|stats] MLP -> out."""
    # Circular conv over the flattened (seq_len * enc_in) axis, f32 accumulate.
    conv = jnp.dot(xf_ref[...], a_ref[...],
                   preferred_element_type=jnp.float32)            # (TB, E)

    # cat([conv, stats], dim=1) @ W0 == conv @ W0[:E] + stats @ W0[E:]
    h = (jnp.dot(conv.astype(w0a_ref.dtype), w0a_ref[...],
                 preferred_element_type=jnp.float32)
         + jnp.dot(stats_ref[...], w0b_ref[...],
                   preferred_element_type=jnp.float32)
         + b0_ref[...].astype(jnp.float32))                       # (TB, H0)
    h = jnp.maximum(h, 0.0)

    h = (jnp.dot(h.astype(w1_ref.dtype), w1_ref[...],
                 preferred_element_type=jnp.float32)
         + b1_ref[...].astype(jnp.float32))                       # (TB, H1)
    h = jnp.maximum(h, 0.0)

    y = jnp.dot(h.astype(w2p_ref.dtype), w2p_ref[...],
                preferred_element_type=jnp.float32)               # (TB, O_pad)
    o_ref[...] = y.astype(o_ref.dtype)                            # lane-dense store


def _build_circular_conv_matrix(w_conv, enc_in, padding=1):
    """A[s*E + e, l] = sum_k w_conv[s, k] * [e == (l + k - padding) mod E].

    With x flattened to (B, S*E), conv = x_flat @ A reproduces the circular
    Conv1d(in=seq_len, out=1, kernel_size=K, padding=padding, circular, no bias).
    """
    S, K = w_conv.shape
    E = enc_in
    l = jnp.arange(E)
    k = jnp.arange(K)
    src = (l[None, :] + k[:, None] - padding) % E                  # (K, E)
    onehot = (src[:, None, :] == jnp.arange(E)[None, :, None]
              ).astype(w_conv.dtype)                               # (K, E, E)
    a = jnp.einsum('sk,kel->sel', w_conv, onehot)                  # (S, E, E)
    return a.reshape(S * E, E)


def projector_forward(x, stats, params, *, tile_b=512):
    """x: (B, seq_len, enc_in), stats: (B, 1, enc_in) -> (B, output_dim)."""
    w_conv, w0, b0, w1, b1, w2 = params
    B, S, E = x.shape
    K = w_conv.shape[1]
    # The torch module uses padding=1 / circular; that is only dimensionally
    # consistent with kernel_size=3 (as in the module's default).
    assert K == 3, "Projector's circular padding=1 assumes kernel_size=3"
    H0 = w0.shape[1]
    H1 = w1.shape[1]
    O = w2.shape[1]
    O_pad = ((O + 127) // 128) * 128

    # ---- wrapper-side layout plumbing (no extra HBM passes over x) ----
    x_flat = x.reshape(B, S * E)                  # contiguous reshape (free)
    stats2 = stats.reshape(B, E)                  # squeeze (B,1,E) -> (B,E)
    a_mat = _build_circular_conv_matrix(w_conv, E, padding=1)   # (S*E, E)
    w0a, w0b = w0[:E, :], w0[E:, :]               # split the concat halves once
    w2p = jnp.pad(w2, ((0, 0), (0, O_pad - O)))   # lane-dense output columns

    tb = min(tile_b, B)
    grid = (pl.cdiv(B, tb),)

    def batch_map(i):
        return (i, 0)

    def fixed_map(i):
        return (0, 0)

    flops = 2 * B * (S * E * E + 2 * E * H0 + H0 * H1 + H1 * O_pad)
    bytes_accessed = 4 * (B * S * E + B * E + S * E * E + 2 * E * H0 + H0
                          + H0 * H1 + H1 + H1 * O_pad + B * O_pad)

    out = pl.pallas_call(
        projector_kernel,
        out_shape=jax.ShapeDtypeStruct((B, O_pad), jnp.float32),
        grid_spec=pltpu.PrefetchScalarGridSpec(
            num_scalar_prefetch=0,
            grid=grid,
            in_specs=[
                pl.BlockSpec((tb, S * E), batch_map),     # x tile (pipelined)
                pl.BlockSpec((tb, E), batch_map),         # stats tile (pipelined)
                pl.BlockSpec((S * E, E), fixed_map),      # conv matrix (resident)
                pl.BlockSpec((E, H0), fixed_map),         # W0[:E]
                pl.BlockSpec((E, H0), fixed_map),         # W0[E:]
                pl.BlockSpec((1, H0), fixed_map),         # b0
                pl.BlockSpec((H0, H1), fixed_map),        # W1
                pl.BlockSpec((1, H1), fixed_map),         # b1
                pl.BlockSpec((H1, O_pad), fixed_map),     # W2 (zero-padded cols)
            ],
            out_specs=pl.BlockSpec((tb, O_pad), batch_map),
        ),
        compiler_params=pltpu.CompilerParams(
            dimension_semantics=("parallel",)),
        cost_estimate=pl.CostEstimate(
            flops=flops, transcendentals=0, bytes_accessed=bytes_accessed),
    )(x_flat, stats2, a_mat, w0a, w0b, b0, w1, b1, w2p)

    return out[:, :O]


def projector_reference(x, stats, params):
    """Pure-JAX reference matching the PyTorch forward (independent path)."""
    w_conv, w0, b0, w1, b1, w2 = params
    B, S, E = x.shape
    K = w_conv.shape[1]
    pad = 1
    hi = lax.Precision.HIGHEST
    xpad = jnp.concatenate([x[:, :, -pad:], x, x[:, :, :pad]], axis=-1)
    conv = jnp.zeros((B, E), jnp.float32)
    for k in range(K):
        conv = conv + jnp.einsum('bse,s->be', xpad[:, :, k:k + E],
                                 w_conv[:, k], precision=hi)
    feat = jnp.concatenate([conv, stats[:, 0, :]], axis=-1)        # (B, 2E)
    h = jax.nn.relu(jnp.dot(feat, w0, precision=hi) + b0)
    h = jax.nn.relu(jnp.dot(h, w1, precision=hi) + b1)
    return jnp.dot(h, w2, precision=hi)


def init_params(key, enc_in, seq_len, hidden_dims, output_dim, kernel_size=3):
    ks = jax.random.split(key, 6)
    scale = 0.1
    # Conv1d weight is (out_ch=1, in_ch=seq_len, K) in torch; store as (seq_len, K).
    w_conv = scale * jax.random.normal(ks[0], (seq_len, kernel_size), jnp.float32)
    # Linear weights stored as (in, out) (== torch weight.T); biases as (1, out).
    w0 = scale * jax.random.normal(ks[1], (2 * enc_in, hidden_dims[0]), jnp.float32)
    b0 = scale * jax.random.normal(ks[2], (1, hidden_dims[0]), jnp.float32)
    w1 = scale * jax.random.normal(ks[3], (hidden_dims[0], hidden_dims[1]), jnp.float32)
    b1 = scale * jax.random.normal(ks[4], (1, hidden_dims[1]), jnp.float32)
    w2 = scale * jax.random.normal(ks[5], (hidden_dims[1], output_dim), jnp.float32)
    return (w_conv, w0, b0, w1, b1, w2)


if __name__ == "__main__":
    # Small shapes consistent with the module: hidden_layers=2, kernel_size=3.
    B, seq_len, enc_in = 2, 8, 4
    hidden_dims = [32, 32]
    output_dim = 4
    kernel_size = 3

    key = jax.random.PRNGKey(0)
    kx, ks, kp = jax.random.split(key, 3)
    x = jax.random.normal(kx, (B, seq_len, enc_in), jnp.float32)
    stats = jax.random.normal(ks, (B, 1, enc_in), jnp.float32)
    params = init_params(kp, enc_in, seq_len, hidden_dims, output_dim, kernel_size)

    y = projector_forward(x, stats, params)
    y = jax.block_until_ready(y)

    y_ref = projector_reference(x, stats, params)
    assert y.shape == (B, output_dim)
    assert jnp.allclose(y, y_ref, atol=1e-3, rtol=1e-3), "mismatch vs reference"

    print("KERNEL_OK")
</pallas_src>

<mosaic_0001>
module attributes {stable_mosaic.version = 11 : i64} {
  func.func @projector_kernel(%arg0: i32, %arg1: memref<2x32xf32, #tpu.memory_space<vmem>>, %arg2: memref<2x4xf32, #tpu.memory_space<vmem>>, %arg3: memref<32x4xf32, #tpu.memory_space<vmem>>, %arg4: memref<4x32xf32, #tpu.memory_space<vmem>>, %arg5: memref<4x32xf32, #tpu.memory_space<vmem>>, %arg6: memref<1x32xf32, #tpu.memory_space<vmem>>, %arg7: memref<32x32xf32, #tpu.memory_space<vmem>>, %arg8: memref<1x32xf32, #tpu.memory_space<vmem>>, %arg9: memref<32x128xf32, #tpu.memory_space<vmem>>, %arg10: memref<2x128xf32, #tpu.memory_space<vmem>>) attributes {dimension_semantics = [#tpu.dimension_semantics<parallel>], iteration_bounds = array<i64: 1>, scalar_prefetch = 0 : i64, scratch_operands = 0 : i64, tpu.core_type = #tpu.core_type<tc>, window_params = [{transform_indices = @transform_0, window_bounds = array<i64: 2, 32>}, {transform_indices = @transform_1, window_bounds = array<i64: 2, 4>}, {pipeline_mode = #tpu.pipeline_mode<synchronous>, transform_indices = @transform_2, window_bounds = array<i64: 32, 4>}, {pipeline_mode = #tpu.pipeline_mode<synchronous>, transform_indices = @transform_3, window_bounds = array<i64: 4, 32>}, {pipeline_mode = #tpu.pipeline_mode<synchronous>, transform_indices = @transform_4, window_bounds = array<i64: 4, 32>}, {pipeline_mode = #tpu.pipeline_mode<synchronous>, transform_indices = @transform_5, window_bounds = array<i64: 1, 32>}, {pipeline_mode = #tpu.pipeline_mode<synchronous>, transform_indices = @transform_6, window_bounds = array<i64: 32, 32>}, {pipeline_mode = #tpu.pipeline_mode<synchronous>, transform_indices = @transform_7, window_bounds = array<i64: 1, 32>}, {pipeline_mode = #tpu.pipeline_mode<synchronous>, transform_indices = @transform_8, window_bounds = array<i64: 32, 128>}, {transform_indices = @transform_9, window_bounds = array<i64: 2, 128>}]} {
    %c0 = arith.constant 0 : index
    %c0_0 = arith.constant 0 : index
    %0 = vector.load %arg1[%c0, %c0_0] : memref<2x32xf32, #tpu.memory_space<vmem>>, vector<2x32xf32>
    %c0_1 = arith.constant 0 : index
    %c0_2 = arith.constant 0 : index
    %1 = vector.load %arg3[%c0_1, %c0_2] : memref<32x4xf32, #tpu.memory_space<vmem>>, vector<32x4xf32>
    %cst = arith.constant dense<0.000000e+00> : vector<2x4xf32>
    %2 = tpu.matmul %0, %1, %cst {dimension_numbers = #tpu.dot_dimension_numbers<[1], [0], [0], [1], [0, 0, 1, 1], [], []>} : vector<2x32xf32>, vector<32x4xf32>, vector<2x4xf32> -> vector<2x4xf32>
    %c0_3 = arith.constant 0 : index
    %c0_4 = arith.constant 0 : index
    %3 = vector.load %arg4[%c0_3, %c0_4] : memref<4x32xf32, #tpu.memory_space<vmem>>, vector<4x32xf32>
    %cst_5 = arith.constant dense<0.000000e+00> : vector<2x32xf32>
    %4 = tpu.matmul %2, %3, %cst_5 {dimension_numbers = #tpu.dot_dimension_numbers<[1], [0], [0], [1], [0, 0, 1, 1], [], []>} : vector<2x4xf32>, vector<4x32xf32>, vector<2x32xf32> -> vector<2x32xf32>
    %c0_6 = arith.constant 0 : index
    %c0_7 = arith.constant 0 : index
    %5 = vector.load %arg2[%c0_6, %c0_7] : memref<2x4xf32, #tpu.memory_space<vmem>>, vector<2x4xf32>
    %c0_8 = arith.constant 0 : index
    %c0_9 = arith.constant 0 : index
    %6 = vector.load %arg5[%c0_8, %c0_9] : memref<4x32xf32, #tpu.memory_space<vmem>>, vector<4x32xf32>
    %cst_10 = arith.constant dense<0.000000e+00> : vector<2x32xf32>
    %7 = tpu.matmul %5, %6, %cst_10 {dimension_numbers = #tpu.dot_dimension_numbers<[1], [0], [0], [1], [0, 0, 1, 1], [], []>} : vector<2x4xf32>, vector<4x32xf32>, vector<2x32xf32> -> vector<2x32xf32>
    %8 = arith.addf %4, %7 : vector<2x32xf32>
    %c0_11 = arith.constant 0 : index
    %c0_12 = arith.constant 0 : index
    %9 = vector.load %arg6[%c0_11, %c0_12] : memref<1x32xf32, #tpu.memory_space<vmem>>, vector<1x32xf32>
    %10 = vector.broadcast %9 : vector<1x32xf32> to vector<2x32xf32>
    %11 = arith.addf %8, %10 : vector<2x32xf32>
    %cst_13 = arith.constant 0.000000e+00 : f32
    %12 = vector.broadcast %cst_13 : f32 to vector<2x32xf32>
    %13 = arith.maximumf %11, %12 : vector<2x32xf32>
    %c0_14 = arith.constant 0 : index
    %c0_15 = arith.constant 0 : index
    %14 = vector.load %arg7[%c0_14, %c0_15] : memref<32x32xf32, #tpu.memory_space<vmem>>, vector<32x32xf32>
    %cst_16 = arith.constant dense<0.000000e+00> : vector<2x32xf32>
    %15 = tpu.matmul %13, %14, %cst_16 {dimension_numbers = #tpu.dot_dimension_numbers<[1], [0], [0], [1], [0, 0, 1, 1], [], []>} : vector<2x32xf32>, vector<32x32xf32>, vector<2x32xf32> -> vector<2x32xf32>
    %c0_17 = arith.constant 0 : index
    %c0_18 = arith.constant 0 : index
    %16 = vector.load %arg8[%c0_17, %c0_18] : memref<1x32xf32, #tpu.memory_space<vmem>>, vector<1x32xf32>
    %17 = vector.broadcast %16 : vector<1x32xf32> to vector<2x32xf32>
    %18 = arith.addf %15, %17 : vector<2x32xf32>
    %cst_19 = arith.constant 0.000000e+00 : f32
    %19 = vector.broadcast %cst_19 : f32 to vector<2x32xf32>
    %20 = arith.maximumf %18, %19 : vector<2x32xf32>
    %c0_20 = arith.constant 0 : index
    %c0_21 = arith.constant 0 : index
    %21 = vector.load %arg9[%c0_20, %c0_21] : memref<32x128xf32, #tpu.memory_space<vmem>>, vector<32x128xf32>
    %cst_22 = arith.constant dense<0.000000e+00> : vector<2x128xf32>
    %22 = tpu.matmul %20, %21, %cst_22 {dimension_numbers = #tpu.dot_dimension_numbers<[1], [0], [0], [1], [0, 0, 1, 1], [], []>} : vector<2x32xf32>, vector<32x128xf32>, vector<2x128xf32> -> vector<2x128xf32>
    %c0_23 = arith.constant 0 : index
    %c0_24 = arith.constant 0 : index
    %23 = vector.load %arg10[%c0_23, %c0_24] : memref<2x128xf32, #tpu.memory_space<vmem>>, vector<2x128xf32>
    tpu.vector_store %arg10[%c0_23, %c0_24], %22 {strides = array<i32>} : memref<2x128xf32, #tpu.memory_space<vmem>>, vector<2x128xf32>,
    return
  }
  func.func @transform_0(%arg0: i32) -> (i32, i32) {
    %c0_i32 = arith.constant 0 : i32
    %c0_i32_0 = arith.constant 0 : i32
    return %arg0, %c0_i32 : i32, i32
  }
  func.func @transform_1(%arg0: i32) -> (i32, i32) {
    %c0_i32 = arith.constant 0 : i32
    %c0_i32_0 = arith.constant 0 : i32
    return %arg0, %c0_i32 : i32, i32
  }
  func.func @transform_2(%arg0: i32) -> (i32, i32) {
    %c0_i32 = arith.constant 0 : i32
    %c0_i32_0 = arith.constant 0 : i32
    %c0_i32_1 = arith.constant 0 : i32
    return %c0_i32, %c0_i32_0 : i32, i32
  }
  func.func @transform_3(%arg0: i32) -> (i32, i32) {
    %c0_i32 = arith.constant 0 : i32
    %c0_i32_0 = arith.constant 0 : i32
    %c0_i32_1 = arith.constant 0 : i32
    return %c0_i32, %c0_i32_0 : i32, i32
  }
  func.func @transform_4(%arg0: i32) -> (i32, i32) {
    %c0_i32 = arith.constant 0 : i32
    %c0_i32_0 = arith.constant 0 : i32
    %c0_i32_1 = arith.constant 0 : i32
    return %c0_i32, %c0_i32_0 : i32, i32
  }
  func.func @transform_5(%arg0: i32) -> (i32, i32) {
    %c0_i32 = arith.constant 0 : i32
    %c0_i32_0 = arith.constant 0 : i32
    %c0_i32_1 = arith.constant 0 : i32
    return %c0_i32, %c0_i32_0 : i32, i32
  }
  func.func @transform_6(%arg0: i32) -> (i32, i32) {
    %c0_i32 = arith.constant 0 : i32
    %c0_i32_0 = arith.constant 0 : i32
    %c0_i32_1 = arith.constant 0 : i32
    return %c0_i32, %c0_i32_0 : i32, i32
  }
  func.func @transform_7(%arg0: i32) -> (i32, i32) {
    %c0_i32 = arith.constant 0 : i32
    %c0_i32_0 = arith.constant 0 : i32
    %c0_i32_1 = arith.constant 0 : i32
    return %c0_i32, %c0_i32_0 : i32, i32
  }
  func.func @transform_8(%arg0: i32) -> (i32, i32) {
    %c0_i32 = arith.constant 0 : i32
    %c0_i32_0 = arith.constant 0 : i32
    %c0_i32_1 = arith.constant 0 : i32
    return %c0_i32, %c0_i32_0 : i32, i32
  }
  func.func @transform_9(%arg0: i32) -> (i32, i32) {
    %c0_i32 = arith.constant 0 : i32
    %c0_i32_0 = arith.constant 0 : i32
    return %arg0, %c0_i32 : i32, i32
  }
}

</mosaic_0001>

<bundles_post_ra>
// kernel: tpu_custom_call.1
= control target key start
LH: loop header
LB: loop body
LE: loop exit
PB: predicated region body
PF: predicated region fallthrough
CT: control target
= control target key end

     0   :  { %14 = vsyncpa [#allocation3], 0  ;;  %s470_s0 = inlined_call_operand.hbm [shape: f32[2,32], index: 0, kind: input, shape index: {}]   ;;  %s471_s1 = inlined_call_operand.hbm [shape: f32[2,4], index: 1, kind: input, shape index: {}]   ;;  %s472_s2 = inlined_call_operand.vmem [shape: f32[32,4], index: 2, kind: input, shape index: {}]   ;;  %s473_s3 = inlined_call_operand.vmem [shape: f32[4,32], index: 3, kind: input, shape index: {}]   ;;  %s474_s4 = inlined_call_operand.vmem [shape: f32[4,32], index: 4, kind: input, shape index: {}]   ;;  %s475_s5 = inlined_call_operand.vmem [shape: f32[1,32], index: 5, kind: input, shape index: {}]   ;;  %s476_s6 = inlined_call_operand.vmem [shape: f32[32,32], index: 6, kind: input, shape index: {}]   ;;  %s477_s7 = inlined_call_operand.vmem [shape: f32[1,32], index: 7, kind: input, shape index: {}]   ;;  %s478_s8 = inlined_call_operand.hbm [shape: f32[32,128], index: 8, kind: input, shape index: {}]   ;;  %s479_s9 = inlined_call_operand.hbm [shape: f32[2,128], index: 9, kind: output, shape index: {}]  }
   0x1   :  { %15 = vsyncpa [#allocation6], 0  ;;  %s33_s11 = sshll.u32 %s471_s1, 4  ;;  %s34_s11 = int_to_ptr.hbm [resolvable:$true] %s33_s11 }
   0x2   :  { %16 = vsyncpa [#allocation4], 0  ;;  %s363_s12 = smov [#allocation5]   ;;  %s22_s16 = sshll.u32 %s470_s0, 4  ;;  %s23_s16 = int_to_ptr.hbm [resolvable:$true] %s22_s16 }
   0x3   :  { %s35_s13 = sshll.u32 %s363_s12, 4  ;;  %s364_s17 = smov [#allocation2]   ;;  %s36_s13 = int_to_ptr.vmem [resolvable:$true] %s35_s13 }
   0x4   :  { %38 = dma.hbm_to_vmem [thread:$0]  %s34_s11, 32, %s36_s13, [#allocation6]  }
   0x5   :  { %s24_s18 = sshll.u32 %s364_s17, 4  ;;  %s55_s21 = sshll.u32 %s478_s8, 4  ;;  %s25_s18 = int_to_ptr.vmem [resolvable:$true] %s24_s18  ;;  %s56_s21 = int_to_ptr.hbm [resolvable:$true] %s55_s21 }
   0x6   :  { %27 = dma.hbm_to_vmem [thread:$0]  %s23_s16, 32, %s25_s18, [#allocation3]  }
   0x7   :  { %s365_s1 = smov [#allocation7]   ;;  %s366_s23 = smov 128  }
   0x8   :  { %s57_s22 = sshll.u32 %s365_s1, 4  ;;  %s367_s24 = smov 8   ;;  %s58_s22 = int_to_ptr.vmem [resolvable:$true] %s57_s22 }
   0x9   :  { %63 = dma.hbm_to_vmem [thread:$0]  %s56_s21, 512, %s58_s22, [#allocation6], %s366_s23, %s366_s23, %s367_s24  }
   0xa   :  { %357 = dma.done.wait [#allocation3], 32  }
   0xb   :  { %358 = vsyncadd [#allocation3], 4294967264 }
   0xc   :  { %359 = dma.done.wait [#allocation6], 544  }
   0xd   :  { %360 = vsyncadd [#allocation6], 4294966752  ;;  %v80_v0 = vld [vmem:[%s472_s2 + $0x18] sm:$0xff]  ;;  %v79_v1 = vld [vmem:[%s472_s2 + $0x10] sm:$0xff]  ;;  %vm81_vm0 = vcmask 261120   ;;  %vm112_vm1 = vcmask 1043456  }
   0xe   :  { %97 = vmatpush.msra.mxu0 %v80_v0  ;;  %v78_v2 = vld [vmem:[%s472_s2 + $0x8] sm:$0xff]  ;;  %v77_v3 = vld [vmem:[%s472_s2] sm:$0xff]  ;;  %vm108_vm2 = vcmask 31744   ;;  %v171_v9 = vld [vmem:[%s476_s6 + $0x18] sm:$0xff]  ;;  %s235_s24 = sshll.u32 %s479_s9, 4  ;;  %s236_s24 = int_to_ptr.hbm [resolvable:$true] %s235_s24 }
   0xf   :  { %v76_v4 = vld [vmem:[#allocation2] sm:$0x3]  ;;  %v106_v7 = vld [vmem:[#allocation5] sm:$0x3]  ;;  %191 = vmatpush.msra.mxu3 %v171_v9  ;;  %v170_v10 = vld [vmem:[%s476_s6 + $0x10] sm:$0xff] }
  0x10   :  { %98 = vmatpush.msra.mxu0 %v79_v1  ;;  %v105_v5 = vld [vmem:[%s473_s3] sm:$0xf]  ;;  %v169_v11 = vld [vmem:[%s476_s6 + $0x8] sm:$0xff]  ;;  %v202_v14 = vld [vmem:[#allocation7 + $0x10] sm:$0xff] }
  0x11   :  { %249 = vmatpush.msk.msra.mxu2 %vm112_vm1, %v105_v5  ;;  %v107_v6 = vld [vmem:[%s474_s4] sm:$0xf]  ;;  %192 = vmatpush.msra.mxu3 %v170_v10  ;;  %v201_v21 = vld [vmem:[#allocation7 + $0x8] sm:$0xff]  ;;  %v200_v22 = vld [vmem:[#allocation7] sm:$0xff] }
  0x12   :  { %99 = vmatpush.msra.mxu0 %v78_v2  ;;  %247 = vmatpush.msk.msra.mxu1 %vm112_vm1, %v107_v6  ;;  %v168_v12 = vld [vmem:[%s476_s6] sm:$0xff] }
  0x13   :  { %248 = vmatmul.msk.f32.vlgmr.msra.gmra.mxu1 %vm108_vm2, %v106_v7  ;;  %193 = vmatpush.msra.mxu3 %v169_v11  ;;  %v203_v13 = vld [vmem:[#allocation7 + $0x18] sm:$0xff] }
  0x14   :  { %100 = vmatpush.msra.mxu0 %v77_v3  ;;  %219 = vmatpush.msrb.mxu1 %v203_v13  ;;  %v259_v16 = vld [vmem:[%s475_s5] ss:$0 sm:$0xff]  ;;  %s368_s5 = smov [#allocation8]  }
  0x15   :  { %246 = vmatmul.msk.f32.vlgmr.msra.gmra.mxu0 %vm81_vm0, %v76_v4  ;;  %194 = vmatpush.msra.mxu3 %v168_v12  ;;  %v260_v23 = vld [vmem:[%s477_s7] ss:$0 sm:$0xff]  ;;  %s233_s1 = sshll.u32 %s368_s5, 4  ;;  %s234_s1 = int_to_ptr.vmem [resolvable:$true] %s233_s1 }
  0x16   :  { %220 = vmatpush.msrb.mxu1 %v202_v14 }
  0x18   :  { %221 = vmatpush.msrb.mxu1 %v201_v21 }
  0x1a   :  { %222 = vmatpush.msrb.mxu1 %v200_v22 }
  0x90   :  { %v133_v15 = vpop.f32.mrf.mxu1 }
  0x92   :  { %v102_v8 = vpop.f32.mrf.mxu0 }
  0x93   :  { %250 = vmatmul.msk.f32.vlgmr.msra.gmra.mxu2 %vm108_vm2, %v102_v8 }
 0x116   :  { %v159_v17 = vpop.f32.mrf.mxu2 }
 0x117   :  { %v160_v18 = vadd.f32 %v159_v17, %v133_v15 }
 0x119   :  { %v166_v19 = vadd.f32 %v259_v16, %v160_v18 }
 0x11b   :  { %v167_v20 = vmax.f32 %v166_v19, 0.0 }
 0x11d   :  { %251 = vmatmul.msk.f32.vlgmr.msra.gmra.mxu3 %vm81_vm0, %v167_v20 }
 0x1a0   :  { %v196_v24 = vpop.f32.mrf.mxu3 }
 0x1a1   :  { %v197_v25 = vadd.f32 %v260_v23, %v196_v24 }
 0x1a3   :  { %v199_v26 = vmax.f32 %v197_v25, 0.0 }
 0x1a5   :  { %252 = vmatmul.msk.f32.vlgmr.msrb.gmra.mxu1 %vm81_vm0, %v199_v26 }
 0x222   :  { %v224_v27 = vpop.f32.mrf.mxu1 }
 0x223   :  { %227 = vst [vmem:[#allocation8] sm:$0x3] %v224_v27 }
 0x224   :  { %238 = dma.vmem_to_hbm [thread:$0]  %s234_s1, 32, %s236_s24, [#allocation4]  }
 0x225   :  { %361 = dma.done.wait [#allocation4], 32  }
 0x226   :  { %362 = vsyncadd [#allocation4], 4294967264 }
 0x227   :  { %243 = vsyncpa [#allocation3], 1 }
 0x228   :  { %244 = vsyncpa [#allocation6], 1 }
 0x229   :  { %245 = vsyncpa [#allocation4], 1 }

</bundles_post_ra>
